<compile_context>
chip_gen: v5e
topology: v5e:2x2
jax: 0.10.0
libtpu: 0.0.40
codegen_flags: <defaults>
</compile_context>

<pallas_src>
import jax
import jax.numpy as jnp
import numpy as np
from jax.experimental import pallas as pl
from jax.experimental.pallas import tpu as pltpu


def _relation_head_kernel(tok_ref, meta_ref, w1t_ref, extra_ref, w2_ref, b2_ref,
                          loss_ref):
    """relation_label_ffn (Linear->ReLU->Linear) + cross-entropy, reduced per block.

    tok_ref  : (rows, D)      f32   token embeddings (cast to bf16 in-kernel)
    meta_ref : (rows, 3)      i32   [ner_idx, instance_indicator_col, target]
    w1t_ref  : (D, HP)        bf16  token block of W1 (resident)
    extra_ref: (1, 8+nb, HP)  bf16  [ner_table@W1_ner ; per-instance bias rows] for block
    w2_ref   : (HP, LP)       bf16  W2 (resident)
    b2_ref   : (1, LP)        f32   b2, padded lanes = -1e30
    loss_ref : (1, 1, 128)    f32   block loss sum (replicated across lanes)
    """
    rows = tok_ref.shape[0]
    kb = extra_ref.shape[1]                                     # 8 + nb

    meta = meta_ref[...]                                        # (rows, 3) int32
    ner = meta[:, 0:1]                                          # (rows, 1)
    instc = meta[:, 1:2]                                        # (rows, 1), in [8, 8+nb)
    tgt = meta[:, 2:3]                                          # (rows, 1)

    # ---- merged one-hot built in-kernel: ner column + per-instance indicator column ----
    k_iota = jax.lax.broadcasted_iota(jnp.int32, (rows, kb), 1)
    onehot = ((k_iota == ner) | (k_iota == instc)).astype(jnp.bfloat16)

    # ---- Linear 1 decomposed (bf16 MXU, f32 accumulate) -------------------------------
    # Linear(concat(tok, subj, type, ner)) == tok@W1_tok + onehot@[ner_w ; inst_bias]
    h = jnp.dot(tok_ref[...].astype(jnp.bfloat16), w1t_ref[...],
                preferred_element_type=jnp.float32)
    h = h + jnp.dot(onehot, extra_ref[0], preferred_element_type=jnp.float32)
    h = jnp.maximum(h, 0.0)                                     # ReLU (f32)

    # ---- Linear 2 -> relation-label logits; padded label lanes killed via b2=-1e30 ----
    s = jnp.dot(h.astype(jnp.bfloat16), w2_ref[...],
                preferred_element_type=jnp.float32) + b2_ref[...]      # (rows, LP) f32

    # ---- cross-entropy rows (ignore_index = -100), reduced to one block scalar --------
    m = jnp.max(s, axis=-1, keepdims=True)
    lse = m + jnp.log(jnp.sum(jnp.exp(s - m), axis=-1, keepdims=True))
    lane = jax.lax.broadcasted_iota(jnp.int32, s.shape, 1)
    tgt_logit = jnp.sum(jnp.where(lane == tgt, s, 0.0), axis=-1, keepdims=True)
    valid = (tgt != -100).astype(jnp.float32)
    loss_rows = (lse - tgt_logit) * valid                        # (rows, 1)

    blk = jnp.sum(loss_rows, axis=0, keepdims=True)              # (1, 1) sublane reduce
    loss_ref[...] = jnp.broadcast_to(blk.reshape(1, 1, 1), (1, 1, 128))


def _pick_instances_per_block(n, t):
    """Row tile = nb*t. Prefer >= 2 grid steps (v7x megacore / pipeline overlap) and
    512-2048 rows per step at realistic sizes; always keep nb*t a multiple of 8."""
    divisors = [d for d in range(1, n + 1) if n % d == 0 and (d * t) % 8 == 0]
    if not divisors:
        return n
    multi_step = [d for d in divisors if n // d >= 2]
    pool = multi_step or divisors
    small_enough = [d for d in pool if d * t <= 2048] or pool
    return max(small_enough)


def re_stage1_relation_loss(bert_outputs, subject_vec, type_feat, ner_idx, ner_table,
                            w1, b1, w2, b2, rel_seqidxs, *, instances_per_block=None):
    """Loss of REStage1Model.forward's span_id (non-CRF branch).

    bert_outputs: [N, T, D] f32   token embeddings after encode()
    subject_vec : [N, D]    f32   get_entity_embedding stand-in
    type_feat   : [N, 100]  f32   type_feature_module(subject_types)
    ner_idx     : [N, T]    int   indices into ner_feature_module (3 entries)
    ner_table   : [3, 10]   f32   ner_feature_module.weight
    w1,b1,w2,b2 : Linears([2D+110, H, L]) parameters
    rel_seqidxs : [N, T]    int   targets, -100 = ignore
    """
    N, T, D = bert_outputs.shape
    F, HID = w1.shape
    L = w2.shape[1]
    TYPE_DIM = type_feat.shape[-1]
    NER_DIM = ner_table.shape[-1]
    NER_ROWS = ner_table.shape[0]
    assert F == 2 * D + TYPE_DIM + NER_DIM
    assert NER_ROWS <= 8

    HP = pl.cdiv(HID, 128) * 128          # lane-dense hidden dim
    LP = pl.cdiv(L, 128) * 128            # lane-dense label dim
    NEG = jnp.float32(-1e30)

    nb = _pick_instances_per_block(N, T) if instances_per_block is None else instances_per_block
    assert N % nb == 0 and (nb * T) % 8 == 0
    G = N // nb                            # grid steps ("parallel")
    rows = nb * T
    M = N * T
    KB = 8 + nb                            # one-hot width: 8 ner cols + nb instance cols

    # --- split W1 by feature block (Linear(concat) == sum of Linears, exact) ---
    w1_tok = w1[:D]
    w1_subj = w1[D:2 * D]
    w1_type = w1[2 * D:2 * D + TYPE_DIM]
    w1_ner = w1[2 * D + TYPE_DIM:]

    # per-instance constants folded into one H-vector (tiny f32 matmuls in the wrapper)
    inst_bias = subject_vec @ w1_subj + type_feat @ w1_type + b1                 # [N, HID]
    # ner embedding folded through W1
    ner_w = ner_table @ w1_ner                                                   # [3, HID]
    ner_block = jnp.zeros((8, HID), jnp.float32).at[:NER_ROWS].set(ner_w)
    # per-block small weight: rows 0..7 = folded ner table, rows 8..8+nb-1 = inst_bias
    extra = jnp.concatenate(
        [jnp.broadcast_to(ner_block[None], (G, 8, HID)), inst_bias.reshape(G, nb, HID)],
        axis=1)                                                                  # [G, KB, HID]
    extra = jnp.pad(extra, ((0, 0), (0, 0), (0, HP - HID))).astype(jnp.bfloat16)

    w1_tok_p = jnp.pad(w1_tok, ((0, 0), (0, HP - HID))).astype(jnp.bfloat16)     # [D, HP]
    w2_p = jnp.pad(w2, ((0, HP - HID), (0, LP - L))).astype(jnp.bfloat16)        # [HP, LP]
    b2_p = jnp.full((1, LP), NEG, jnp.float32).at[0, :L].set(b2.astype(jnp.float32))

    # dominant token stream stays f32 (reshape only, no copy); cast to bf16 in-kernel
    tok = bert_outputs.reshape(M, D)
    # one small int32 side stream: ner index, instance-indicator column, target
    inst_col = 8 + (jnp.arange(N, dtype=jnp.int32) % nb)                          # [N]
    meta = jnp.stack(
        [ner_idx.astype(jnp.int32),
         jnp.broadcast_to(inst_col[:, None], (N, T)),
         rel_seqidxs.astype(jnp.int32)], axis=-1).reshape(M, 3)                   # [M, 3]

    cost = pl.CostEstimate(
        flops=int(2 * M * (D * HP + KB * HP + HP * LP)),
        transcendentals=int(M * (LP + 1)),
        bytes_accessed=int(M * D * 4 + M * 3 * 4
                           + D * HP * 2 + G * KB * HP * 2 + HP * LP * 2 + LP * 4
                           + G * 128 * 4),
    )

    block_sums = pl.pallas_call(
        _relation_head_kernel,
        out_shape=jax.ShapeDtypeStruct((G, 1, 128), jnp.float32),
        grid_spec=pltpu.PrefetchScalarGridSpec(
            num_scalar_prefetch=0,
            grid=(G,),
            in_specs=[
                pl.BlockSpec((rows, D), lambda i: (i, 0)),       # token embeddings (f32)
                pl.BlockSpec((rows, 3), lambda i: (i, 0)),       # ner/inst/target (int32)
                pl.BlockSpec((D, HP), lambda i: (0, 0)),         # W1 token block (resident)
                pl.BlockSpec((1, KB, HP), lambda i: (i, 0, 0)),  # per-block [ner_w; bias]
                pl.BlockSpec((HP, LP), lambda i: (0, 0)),        # W2 (resident)
                pl.BlockSpec((1, LP), lambda i: (0, 0)),         # b2 (-1e30 on pad lanes)
            ],
            out_specs=pl.BlockSpec((1, 1, 128), lambda i: (i, 0, 0)),
        ),
        # No carried accumulator -> row axis is truly parallel (both v7x TCs usable).
        compiler_params=pltpu.CompilerParams(dimension_semantics=("parallel",)),
        cost_estimate=cost,
    )(tok, meta, w1_tok_p, extra, w2_p, b2_p)

    # F.cross_entropy 'mean' over non-ignored targets; denominator depends only on targets.
    loss_sum = jnp.sum(block_sums[:, 0, 0])
    valid_count = jnp.sum((rel_seqidxs != -100).astype(jnp.float32))
    return loss_sum / valid_count


def reference_loss(bert_outputs, subject_vec, type_feat, ner_idx, ner_table,
                   w1, b1, w2, b2, rel_seqidxs):
    """Pure-JAX f32 reference matching the module's forward (non-CRF branch)."""
    N, T, D = bert_outputs.shape
    ext_subj = jnp.broadcast_to(subject_vec[:, None, :], (N, T, D))
    ext_type = jnp.broadcast_to(type_feat[:, None, :], (N, T, type_feat.shape[-1]))
    ner_emb = ner_table[ner_idx]
    feats = jnp.concatenate([bert_outputs, ext_subj, ext_type, ner_emb], axis=-1)
    x = feats.reshape(N * T, -1)
    h = jnp.maximum(x @ w1 + b1, 0.0)
    s = h @ w2 + b2
    t = rel_seqidxs.reshape(-1)
    valid = t != -100
    t_safe = jnp.where(valid, t, 0)
    logp = jax.nn.log_softmax(s, axis=-1)
    nll = -jnp.take_along_axis(logp, t_safe[:, None], axis=1)[:, 0]
    return jnp.sum(jnp.where(valid, nll, 0.0)) / jnp.sum(valid)


if __name__ == "__main__":
    key = jax.random.PRNGKey(0)
    ks = jax.random.split(key, 14)

    # ---- small synthetic shapes consistent with the forward pass ----
    N = 4          # number of subject instances ("batch" after process_data)
    T = 16         # padded token count (max_token_num)
    P = 24         # wordpiece sequence length fed to BERT
    D = 32         # bert_dim (hidden size)
    E = 7          # entity_type_num
    L = 9          # relation_label_num (BIO over 4 relation types + O)
    HID = 64       # config.linear_hidden_num
    F_DIM = 2 * D + 100 + 10   # span + type + ner features -> 174

    # ---- encode(): BERT output stand-in + multi_piece='first' gather (glue) ----
    piece_emb = jax.random.normal(ks[0], (N, P, D), jnp.float32)          # synthetic BERT outputs
    offsets = jax.random.randint(ks[1], (N, T), 0, P - 1)                 # first-piece offsets
    bert_outputs = jnp.take_along_axis(piece_emb, (offsets + 1)[..., None], axis=1)  # [N, T, D]
    # bert_dropout: identity (deterministic)

    # ---- span feature: subject embedding (span-start token embedding) ----
    subj_starts = jax.random.randint(ks[2], (N,), 0, T)                   # subjects[i][0]
    subject_vec = jnp.take_along_axis(
        bert_outputs, subj_starts[:, None, None].repeat(D, axis=2), axis=1)[:, 0, :]   # [N, D]

    # ---- type feature: nn.Embedding(entity_type_num, 100) ----
    type_table = 0.02 * jax.random.normal(ks[3], (E, 100), jnp.float32)
    subject_types = jax.random.randint(ks[4], (N,), 0, E)
    type_feat = type_table[subject_types]                                 # [N, 100]

    # ---- ner feature: nn.Embedding(3, 10) over per-token ner_feats ----
    ner_table = 0.02 * jax.random.normal(ks[5], (3, 10), jnp.float32)
    ner_idx = jax.random.randint(ks[6], (N, T), 0, 3)                     # [N, T]

    # ---- relation_label_ffn parameters (Linears([F, HID, L], relu, bias)) ----
    w1 = 0.02 * jax.random.normal(ks[7], (F_DIM, HID), jnp.float32)
    b1 = 0.02 * jax.random.normal(ks[11], (HID,), jnp.float32)
    w2 = 0.02 * jax.random.normal(ks[8], (HID, L), jnp.float32)
    b2 = 0.02 * jax.random.normal(ks[12], (L,), jnp.float32)

    # ---- targets: relation_seqidxs with -100 padding on padded token positions ----
    tok_lens = jax.random.randint(ks[9], (N,), T // 2, T + 1)             # tokens per instance
    raw_tgt = jax.random.randint(ks[10], (N, T), 0, L)
    pos = jnp.arange(T)[None, :]
    rel_seqidxs = jnp.where(pos < tok_lens[:, None], raw_tgt, -100)       # [N, T]

    # ---- run the Pallas hot path (default tiling: 2 parallel grid steps of 32 rows) ----
    loss_fn = jax.jit(re_stage1_relation_loss)
    loss = jax.block_until_ready(loss_fn(bert_outputs, subject_vec, type_feat, ner_idx,
                                         ner_table, w1, b1, w2, b2, rel_seqidxs))

    ref = jax.block_until_ready(reference_loss(
        bert_outputs, subject_vec, type_feat, ner_idx, ner_table, w1, b1, w2, b2, rel_seqidxs))
    # bf16 MXU inputs (incl. folded instance bias) -> slightly looser tolerance than pure f32
    assert np.allclose(np.asarray(loss), np.asarray(ref), rtol=2e-2, atol=2e-3), (loss, ref)

    print("KERNEL_OK")
</pallas_src>

<mosaic_0001>
module attributes {stable_mosaic.version = 11 : i64} {
  func.func @_relation_head_kernel(%arg0: i32, %arg1: memref<32x32xf32, #tpu.memory_space<vmem>>, %arg2: memref<32x3xi32, #tpu.memory_space<vmem>>, %arg3: memref<32x128xbf16, #tpu.memory_space<vmem>>, %arg4: memref<1x10x128xbf16, #tpu.memory_space<vmem>>, %arg5: memref<128x128xbf16, #tpu.memory_space<vmem>>, %arg6: memref<1x128xf32, #tpu.memory_space<vmem>>, %arg7: memref<1x1x128xf32, #tpu.memory_space<vmem>>) attributes {dimension_semantics = [#tpu.dimension_semantics<parallel>], iteration_bounds = array<i64: 2>, scalar_prefetch = 0 : i64, scratch_operands = 0 : i64, tpu.core_type = #tpu.core_type<tc>, window_params = [{transform_indices = @transform_0, window_bounds = array<i64: 32, 32>}, {transform_indices = @transform_1, window_bounds = array<i64: 32, 3>}, {pipeline_mode = #tpu.pipeline_mode<synchronous>, transform_indices = @transform_2, window_bounds = array<i64: 32, 128>}, {transform_indices = @transform_3, window_bounds = array<i64: 1, 10, 128>}, {pipeline_mode = #tpu.pipeline_mode<synchronous>, transform_indices = @transform_4, window_bounds = array<i64: 128, 128>}, {pipeline_mode = #tpu.pipeline_mode<synchronous>, transform_indices = @transform_5, window_bounds = array<i64: 1, 128>}, {transform_indices = @transform_6, window_bounds = array<i64: 1, 1, 128>}]} {
    %c0 = arith.constant 0 : index
    %c0_0 = arith.constant 0 : index
    %0 = vector.load %arg2[%c0, %c0_0] : memref<32x3xi32, #tpu.memory_space<vmem>>, vector<32x3xi32>
    %1 = vector.extract_strided_slice %0 {offsets = [0, 0], sizes = [32, 1], strides = [1, 1]} : vector<32x3xi32> to vector<32x1xi32>
    %2 = vector.extract_strided_slice %0 {offsets = [0, 1], sizes = [32, 1], strides = [1, 1]} : vector<32x3xi32> to vector<32x1xi32>
    %3 = vector.extract_strided_slice %0 {offsets = [0, 2], sizes = [32, 1], strides = [1, 1]} : vector<32x3xi32> to vector<32x1xi32>
    %4 = tpu.iota {dimensions = array<i32: 1>} : vector<32x10xi32>
    %5 = vector.broadcast %1 : vector<32x1xi32> to vector<32x10xi32>
    %6 = arith.cmpi eq, %4, %5 : vector<32x10xi32>
    %7 = vector.broadcast %2 : vector<32x1xi32> to vector<32x10xi32>
    %8 = arith.cmpi eq, %4, %7 : vector<32x10xi32>
    %9 = arith.ori %6, %8 : vector<32x10xi1>
    %10 = arith.extui %9 : vector<32x10xi1> to vector<32x10xi32>
    %11 = arith.sitofp %10 : vector<32x10xi32> to vector<32x10xf32>
    %12 = arith.truncf %11 : vector<32x10xf32> to vector<32x10xbf16>
    %c0_1 = arith.constant 0 : index
    %c0_2 = arith.constant 0 : index
    %13 = vector.load %arg1[%c0_1, %c0_2] : memref<32x32xf32, #tpu.memory_space<vmem>>, vector<32x32xf32>
    %14 = arith.truncf %13 : vector<32x32xf32> to vector<32x32xbf16>
    %c0_3 = arith.constant 0 : index
    %c0_4 = arith.constant 0 : index
    %15 = vector.load %arg3[%c0_3, %c0_4] : memref<32x128xbf16, #tpu.memory_space<vmem>>, vector<32x128xbf16>
    %cst = arith.constant dense<0.000000e+00> : vector<32x128xf32>
    %16 = tpu.matmul %14, %15, %cst {dimension_numbers = #tpu.dot_dimension_numbers<[1], [0], [0], [1], [0, 0, 1, 1], [], []>} : vector<32x32xbf16>, vector<32x128xbf16>, vector<32x128xf32> -> vector<32x128xf32>
    %c0_5 = arith.constant 0 : index
    %c0_6 = arith.constant 0 : index
    %c0_7 = arith.constant 0 : index
    %17 = vector.load %arg4[%c0_5, %c0_6, %c0_7] : memref<1x10x128xbf16, #tpu.memory_space<vmem>>, vector<1x10x128xbf16>
    %18 = vector.shape_cast %17 : vector<1x10x128xbf16> to vector<10x128xbf16>
    %cst_8 = arith.constant dense<0.000000e+00> : vector<32x128xf32>
    %19 = tpu.matmul %12, %18, %cst_8 {dimension_numbers = #tpu.dot_dimension_numbers<[1], [0], [0], [1], [0, 0, 1, 1], [], []>} : vector<32x10xbf16>, vector<10x128xbf16>, vector<32x128xf32> -> vector<32x128xf32>
    %20 = arith.addf %16, %19 : vector<32x128xf32>
    %cst_9 = arith.constant 0.000000e+00 : f32
    %21 = vector.broadcast %cst_9 : f32 to vector<32x128xf32>
    %22 = arith.maximumf %20, %21 : vector<32x128xf32>
    %23 = arith.truncf %22 : vector<32x128xf32> to vector<32x128xbf16>
    %c0_10 = arith.constant 0 : index
    %c0_11 = arith.constant 0 : index
    %24 = vector.load %arg5[%c0_10, %c0_11] : memref<128x128xbf16, #tpu.memory_space<vmem>>, vector<128x128xbf16>
    %cst_12 = arith.constant dense<0.000000e+00> : vector<32x128xf32>
    %25 = tpu.matmul %23, %24, %cst_12 {dimension_numbers = #tpu.dot_dimension_numbers<[1], [0], [0], [1], [0, 0, 1, 1], [], []>} : vector<32x128xbf16>, vector<128x128xbf16>, vector<32x128xf32> -> vector<32x128xf32>
    %c0_13 = arith.constant 0 : index
    %c0_14 = arith.constant 0 : index
    %26 = vector.load %arg6[%c0_13, %c0_14] : memref<1x128xf32, #tpu.memory_space<vmem>>, vector<1x128xf32>
    %27 = vector.broadcast %26 : vector<1x128xf32> to vector<32x128xf32>
    %28 = arith.addf %25, %27 : vector<32x128xf32>
    %cst_15 = arith.constant dense<0xFF800000> : vector<32xf32>
    %29 = vector.multi_reduction <maximumf>, %28, %cst_15 [1] : vector<32x128xf32> to vector<32xf32>
    %30 = vector.shape_cast %29 : vector<32xf32> to vector<32x1xf32>
    %31 = vector.broadcast %30 : vector<32x1xf32> to vector<32x128xf32>
    %32 = arith.subf %28, %31 : vector<32x128xf32>
    %33 = math.exp %32 : vector<32x128xf32>
    %cst_16 = arith.constant dense<0.000000e+00> : vector<32xf32>
    %34 = vector.multi_reduction <add>, %33, %cst_16 [1] : vector<32x128xf32> to vector<32xf32>
    %35 = vector.shape_cast %34 : vector<32xf32> to vector<32x1xf32>
    %36 = math.log %35 : vector<32x1xf32>
    %37 = arith.addf %30, %36 : vector<32x1xf32>
    %38 = tpu.iota {dimensions = array<i32: 1>} : vector<32x128xi32>
    %39 = vector.broadcast %3 : vector<32x1xi32> to vector<32x128xi32>
    %40 = arith.cmpi eq, %38, %39 : vector<32x128xi32>
    %cst_17 = arith.constant 0.000000e+00 : f32
    %41 = vector.broadcast %cst_17 : f32 to vector<32x128xf32>
    %42 = arith.select %40, %28, %41 : vector<32x128xi1>, vector<32x128xf32>
    %cst_18 = arith.constant dense<0.000000e+00> : vector<32xf32>
    %43 = vector.multi_reduction <add>, %42, %cst_18 [1] : vector<32x128xf32> to vector<32xf32>
    %44 = vector.shape_cast %43 : vector<32xf32> to vector<32x1xf32>
    %c-100_i32 = arith.constant -100 : i32
    %45 = vector.broadcast %c-100_i32 : i32 to vector<32x1xi32>
    %46 = arith.cmpi ne, %3, %45 : vector<32x1xi32>
    %47 = arith.extui %46 : vector<32x1xi1> to vector<32x1xi32>
    %48 = arith.sitofp %47 : vector<32x1xi32> to vector<32x1xf32>
    %49 = arith.subf %37, %44 : vector<32x1xf32>
    %50 = arith.mulf %49, %48 : vector<32x1xf32>
    %cst_19 = arith.constant dense<0.000000e+00> : vector<1xf32>
    %51 = vector.multi_reduction <add>, %50, %cst_19 [0] : vector<32x1xf32> to vector<1xf32>
    %52 = vector.shape_cast %51 : vector<1xf32> to vector<1x1xf32>
    %53 = vector.shape_cast %52 : vector<1x1xf32> to vector<1x1x1xf32>
    %54 = vector.shape_cast %53 : vector<1x1x1xf32> to vector<1x1x1xf32>
    %55 = vector.broadcast %54 : vector<1x1x1xf32> to vector<1x1x128xf32>
    %c0_20 = arith.constant 0 : index
    %c0_21 = arith.constant 0 : index
    %c0_22 = arith.constant 0 : index
    %56 = vector.load %arg7[%c0_20, %c0_21, %c0_22] : memref<1x1x128xf32, #tpu.memory_space<vmem>>, vector<1x1x128xf32>
    tpu.vector_store %arg7[%c0_20, %c0_21, %c0_22], %55 {strides = array<i32>} : memref<1x1x128xf32, #tpu.memory_space<vmem>>, vector<1x1x128xf32>,
    return
  }
  func.func @transform_0(%arg0: i32) -> (i32, i32) {
    %c0_i32 = arith.constant 0 : i32
    %c0_i32_0 = arith.constant 0 : i32
    return %arg0, %c0_i32 : i32, i32
  }
  func.func @transform_1(%arg0: i32) -> (i32, i32) {
    %c0_i32 = arith.constant 0 : i32
    %c0_i32_0 = arith.constant 0 : i32
    return %arg0, %c0_i32 : i32, i32
  }
  func.func @transform_2(%arg0: i32) -> (i32, i32) {
    %c0_i32 = arith.constant 0 : i32
    %c0_i32_0 = arith.constant 0 : i32
    %c0_i32_1 = arith.constant 0 : i32
    return %c0_i32, %c0_i32_0 : i32, i32
  }
  func.func @transform_3(%arg0: i32) -> (i32, i32, i32) {
    %c0_i32 = arith.constant 0 : i32
    %c0_i32_0 = arith.constant 0 : i32
    %c0_i32_1 = arith.constant 0 : i32
    return %arg0, %c0_i32, %c0_i32_0 : i32, i32, i32
  }
  func.func @transform_4(%arg0: i32) -> (i32, i32) {
    %c0_i32 = arith.constant 0 : i32
    %c0_i32_0 = arith.constant 0 : i32
    %c0_i32_1 = arith.constant 0 : i32
    return %c0_i32, %c0_i32_0 : i32, i32
  }
  func.func @transform_5(%arg0: i32) -> (i32, i32) {
    %c0_i32 = arith.constant 0 : i32
    %c0_i32_0 = arith.constant 0 : i32
    %c0_i32_1 = arith.constant 0 : i32
    return %c0_i32, %c0_i32_0 : i32, i32
  }
  func.func @transform_6(%arg0: i32) -> (i32, i32, i32) {
    %c0_i32 = arith.constant 0 : i32
    %c0_i32_0 = arith.constant 0 : i32
    %c0_i32_1 = arith.constant 0 : i32
    return %arg0, %c0_i32, %c0_i32_0 : i32, i32, i32
  }
}

</mosaic_0001>

<bundles_post_ra>
// kernel: re_stage1_relation_loss.1
= control target key start
LH: loop header
LB: loop body
LE: loop exit
PB: predicated region body
PF: predicated region fallthrough
CT: control target
= control target key end

     0   :  { %s874_s21 = smov 0   ;;  %s985_s0 = inlined_call_operand.vmem [shape: f32[64,32], index: 0, kind: input, shape index: {}]   ;;  %s986_s1 = inlined_call_operand.vmem [shape: s32[64,3], index: 1, kind: input, shape index: {}]   ;;  %s987_s2 = inlined_call_operand.vmem [shape: bf16[32,128], index: 2, kind: input, shape index: {}]   ;;  %s988_s3 = inlined_call_operand.vmem [shape: bf16[2,10,128], index: 3, kind: input, shape index: {}]   ;;  %s989_s4 = inlined_call_operand.vmem [shape: bf16[128,128], index: 4, kind: input, shape index: {}]   ;;  %s990_s5 = inlined_call_operand.vmem [shape: f32[1,128], index: 5, kind: input, shape index: {}]   ;;  %s991_s6 = inlined_call_operand.vmem [shape: f32[2,1,128], index: 6, kind: output, shape index: {}]  }
   0x1 LB: > { %s880_s22 = sadd.s32 4294967295, %s833_s21   ;;  %p706_p0 = scmp.ge.s32.totalorder %s833_s21, 1  ;;  %s833_s21 = sphi %s874_s21, %s16_s21  }
   0x2   : > { %p234_p1 = scmp.lt.s32.totalorder %s833_s21, 3 }
   0x4   : > { %p235_p2 = pnand %p706_p0, %p234_p1 }
   0x5   : > { %s707_s23 = sshll.u32 (!%p235_p2), %s880_s22, 2  ;;  %p284_p4 = scmp.lt.s32.totalorder (!%p235_p2), %s880_s22, 1 }
   0x6   : > { %238 = sbr.rel (%p235_p2) target bundleno = 811 (0x32b), region = 44  ;;  %p273_p3 = scmp.lt.s32.totalorder (!%p235_p2), %s707_s23, 7 }
   0xb   : > { %v773_v0 = vld [vmem:[%s987_s2 + $0x8] sm:$0xff]  ;;  %v835_v1 = vmov 1   ;;  %v836_v2 = vmov 0   ;;  %s993_s23 = smov (!%p273_p3, %s707_s23), 7  ;;  %s995_s22 = smov (!%p284_p4, %s880_s22), 1  ;;  %v772_v7 = vld [vmem:[%s987_s2] sm:$0xff]  ;;  %v297_v18 = vlaneseq }
   0xc   : > { %804 = vset.pattern.permute.xlu1 %v835_v1  ;;  %803 = vset.pattern.permute.xlu0 %v836_v2  ;;  %s708_s26 = sshll.u32 %s993_s23, 3  ;;  %s771_s11 = sshll.u32 %s995_s22, 3  ;;  %vm404_vm0 = vcmask 261120   ;;  %vm369_vm1 = vcmask 1044480   ;;  %v782_v19 = vld [vmem:[%s989_s4 + $0x38] sm:$0xff]  ;;  %v781_v22 = vld [vmem:[%s989_s4 + $0x30] sm:$0xff] }
   0xd   : > { %805 = vset.pattern.permute.xlu2 %v836_v2  ;;  %417 = vmatpush.bf16.msra.mxu1 %v773_v0  ;;  %s282_s29 = scalar_lea.vmem %s986_s1, %s708_s26  ;;  %s276_s8 = scalar_lea.vmem %s985_s0, %s708_s26  ;;  %v927_v23 = vand.u32 127, %v297_v18  ;;  %v837_v27 = vmov 0.0   ;;  %vm362_vm8 = vcmask 80896   ;;  %v780_v37 = vld [vmem:[%s989_s4 + $0x28] sm:$0xff]  ;;  %v779_v38 = vld [vmem:[%s989_s4 + $0x20] sm:$0xff]  ;;  %v778_v39 = vld [vmem:[%s989_s4 + $0x18] sm:$0xff] }
   0xe   : > { %v891_v3 = vld [vmem:[%s282_s29] sm:$0xff]  ;;  %v895_v4 = vld [vmem:[%s282_s29 + $0x10] sm:$0xff]  ;;  %v898_v5 = vld [vmem:[%s282_s29 + $0x8] sm:$0xff]  ;;  %s288_s14 = scalar_lea.vmem %s988_s3, %s771_s11  ;;  %504 = vmatpush.bf16.msra.mxu2 %v782_v19  ;;  %783 = vmatpush.bf16.msra.mxu3 %v782_v19  ;;  %v838_v45 = vmov 2   ;;  %s291_s13 = scalar_lea.vmem %s991_s6, %s995_s22 }
   0xf   : > { %316 = vperm.xlu1 %804, %v891_v3   ;;  %300 = vperm.xlu0 %803, %v891_v3   ;;  %v902_v6 = vld [vmem:[%s282_s29 + $0x18] sm:$0xff]  ;;  %v345_v8 = vld [vmem:[%s276_s8] sm:$0xff]  ;;  %v346_v9 = vld [vmem:[%s276_s8 + $0x8] sm:$0xff] }
  0x10   : > { %306 = vperm.xlu2 %805, %v895_v4   ;;  %v349_v10 = vpack.c.bf16 %v346_v9, %v345_v8  ;;  %v719_v11 = vld [vmem:[%s288_s14] sm:$0xf]  ;;  %v774_v12 = vld [vmem:[%s288_s14] sm:$0x10]  ;;  %v347_v15 = vld [vmem:[%s276_s8 + $0x10] sm:$0xff] }
  0x11   : > { %418 = vmatpush.bf16.msra.mxu1 %v772_v7  ;;  %v720_v13 = vor.u32 %v774_v12, %v719_v11  ;;  %v348_v16 = vld [vmem:[%s276_s8 + $0x18] sm:$0xff]  ;;  %v777_v40 = vld [vmem:[%s989_s4 + $0x10] sm:$0xff]  ;;  %v776_v41 = vld [vmem:[%s989_s4 + $0x8] sm:$0xff] }
  0x12   : > { %v350_v17 = vpack.c.bf16 %v348_v16, %v347_v15  ;;  %505 = vmatpush.bf16.msra.mxu2 %v781_v22  ;;  %784 = vmatpush.bf16.msra.mxu3 %v781_v22  ;;  %v775_v42 = vld [vmem:[%s989_s4] sm:$0xff] }
  0x13   : > { %v371_v14 = vsel %vm369_vm1, %v720_v13, 0  ;;  %v810_v62 = vld [vmem:[%s990_s5] ss:$0 sm:$0xff] }
  0x14   : > { %731 = vmatmul.msk.bf16.vlgmr.msra.gmra.mxu1 %vm404_vm0, %v349_v10  ;;  %380 = vmatpush.bf16.msra.mxu0 %v371_v14 }
  0x16   : > { %506 = vmatpush.bf16.msra.mxu2 %v780_v37  ;;  %785 = vmatpush.bf16.msra.mxu3 %v780_v37 }
  0x17   : > { %319 = vperm.xlu1 %804, %v898_v5   ;;  %303 = vperm.xlu0 %803, %v898_v5  }
  0x18   : > { %309 = vperm.xlu2 %805, %v902_v6  }
  0x1a   : > { %507 = vmatpush.bf16.msra.mxu2 %v779_v38  ;;  %786 = vmatpush.bf16.msra.mxu3 %v779_v38 }
  0x1e   : > { %508 = vmatpush.bf16.msra.mxu2 %v778_v39  ;;  %787 = vmatpush.bf16.msra.mxu3 %v778_v39 }
  0x1f   : > { %325 = vperm.xlu1 %804, %v902_v6   ;;  %806 = vset.pattern.permute.xlu0 %v835_v1 }
  0x20   : > { %322 = vperm.xlu0 %806, %v895_v4   ;;  %807 = vset.pattern.permute.xlu2 %v838_v45 }
  0x21   : > { %564 = vperm.xlu2 %807, %v891_v3  }
  0x22   : > { %509 = vmatpush.bf16.msra.mxu2 %v777_v40  ;;  %788 = vmatpush.bf16.msra.mxu3 %v777_v40 }
  0x24   : > { %732 = vmatmul.msk.bf16.gmra.mxu1 %vm404_vm0, %v350_v17 }
  0x26   : > { %510 = vmatpush.bf16.msra.mxu2 %v776_v41  ;;  %789 = vmatpush.bf16.msra.mxu3 %v776_v41 }
  0x27   : > { %808 = vset.pattern.permute.xlu1 %v838_v45 }
  0x28   : > { %809 = vset.pattern.permute.xlu0 %v838_v45 }
  0x2a   : > { %511 = vmatpush.bf16.msra.mxu2 %v775_v42  ;;  %790 = vmatpush.bf16.msra.mxu3 %v775_v42 }
  0x6a   : > { %v307_v24 = vpop.permute.xlu2 %306 }
  0x6b   : > { %vm313_vm11 = vcmp.eq.s32.totalorder %v927_v23, %v307_v24 }
  0x72   : > { %v310_v31 = vpop.permute.xlu2 %309 }
  0x73   : > { %vm314_vm9 = vcmp.eq.s32.totalorder %v927_v23, %v310_v31 }
  0x7b   : > { %v565_v11 = vpop.permute.xlu2 %564 }
  0x7c   : > { %vm575_vm15 = vcmp.eq.s32.totalorder %v927_v23, %v565_v11 }
  0x81   : > { %v317_v20 = vpop.permute.xlu1 %316  ;;  %v301_v21 = vpop.permute.xlu0 %300 }
  0x82   : > { %vm327_vm2 = vcmp.eq.s32.totalorder %v927_v23, %v317_v20  ;;  %vm311_vm3 = vcmp.eq.s32.totalorder %v927_v23, %v301_v21 }
  0x83   : > { %vm331_vm4 = vmor %vm311_vm3, %vm327_vm2  ;;  %vm591_vm3 = vcmp.ne.s32.totalorder %v891_v3, 4294967196 }
  0x84   : > { %v713_v28 = vsel %vm331_vm4, 1.0, %v837_v27  ;;  %vm592_vm4 = vcmp.ne.s32.totalorder %v898_v5, 4294967196 }
  0x89   : > { %v320_v25 = vpop.permute.xlu1 %319  ;;  %v304_v26 = vpop.permute.xlu0 %303 }
  0x8a   : > { %vm328_vm5 = vcmp.eq.s32.totalorder %v927_v23, %v320_v25  ;;  %vm312_vm6 = vcmp.eq.s32.totalorder %v927_v23, %v304_v26 }
  0x8b   : > { %vm332_vm7 = vmor %vm312_vm6, %vm328_vm5  ;;  %vm593_vm5 = vcmp.ne.s32.totalorder %v895_v4, 4294967196  ;;  %vm611_vm6 = vcmask 23568  }
  0x8c   : > { %v714_v29 = vsel %vm332_vm7, 1.0, %v837_v27  ;;  %v767_v3 = vsel %vm593_vm5, 1.0, %v837_v27  ;;  %vm594_vm7 = vcmp.ne.s32.totalorder %v902_v6, 4294967196 }
  0x8d   : > { %v343_v30 = vpack.c.bf16 %v714_v29, %v713_v28 }
  0x8f   : > { %721 = vmatmul.msk.bf16.vlgmr.msra.gmra.mxu0 %vm362_vm8, %v343_v30 }
  0x91   : > { %v326_v32 = vpop.permute.xlu1 %325  ;;  %v420_v43 = vpop.f32.mrf.mxu1 }
  0x92   : > { %v323_v33 = vpop.permute.xlu0 %322  ;;  %vm330_vm10 = vcmp.eq.s32.totalorder %v927_v23, %v326_v32 }
  0x93   : > { %vm329_vm12 = vcmp.eq.s32.totalorder %v927_v23, %v323_v33  ;;  %vm334_vm13 = vmor %vm314_vm9, %vm330_vm10 }
  0x94   : > { %vm333_vm14 = vmor %vm313_vm11, %vm329_vm12  ;;  %v716_v34 = vsel %vm334_vm13, 1.0, %v837_v27 }
  0x95   : > { %v715_v35 = vsel %vm333_vm14, 1.0, %v837_v27 }
  0x96   : > { %v344_v36 = vpack.c.bf16 %v716_v34, %v715_v35 }
  0x99   : > { %v422_v46 = vpop.f32.mrf.mxu1 }
  0x9f   : > { %722 = vmatmul.msk.bf16.gmra.mxu0 %vm362_vm8, %v344_v36 }
  0xa1   : > { %v425_v53 = vpop.f32.mrf.mxu1 }
  0xa9   : > { %v427_v56 = vpop.f32.mrf.mxu1 }
 0x10c   : > { %v382_v44 = vpop.f32.mrf.mxu0 }
 0x10d   : > { %v421_v47 = vadd.f32 %v420_v43, %v382_v44 }
 0x10f   : > { %v430_v50 = vmax.f32 %v421_v47, 0.0 }
 0x114   : > { %v384_v48 = vpop.f32.mrf.mxu0 }
 0x115   : > { %v423_v49 = vadd.f32 %v422_v46, %v384_v48 }
 0x117   : > { %v431_v51 = vmax.f32 %v423_v49, 0.0 }
 0x119   : > { %v434_v52 = vpack.c.bf16 %v431_v51, %v430_v50 }
 0x11b   : > { %512 = vmatmul.bf16.vlgmr.msra.gmra.mxu2 %v434_v52  ;;  %v765_v52 = vsel %vm591_vm3, 1.0, %v837_v27 }
 0x11c   : > { %v387_v54 = vpop.f32.mrf.mxu0 }
 0x11d   : > { %v426_v55 = vadd.f32 %v425_v53, %v387_v54  ;;  %v766_v54 = vsel %vm592_vm4, 1.0, %v837_v27 }
 0x11f   : > { %v432_v59 = vmax.f32 %v426_v55, 0.0 }
 0x124   : > { %v389_v57 = vpop.f32.mrf.mxu0 }
 0x125   : > { %v428_v58 = vadd.f32 %v427_v56, %v389_v57 }
 0x127   : > { %v433_v60 = vmax.f32 %v428_v58, 0.0 }
 0x129   : > { %v435_v61 = vpack.c.bf16 %v433_v60, %v432_v59 }
 0x12b   : > { %517 = vmatmul.bf16.vlgmr.msra.gmra.mxu3 %v435_v61 }
 0x19e   : > { %v513_v63 = vpop.f32.mrf.mxu2 }
 0x19f   : > { %v514_v0 = vadd.f32 %v810_v62, %v513_v63 }
 0x1a1   : > { %523 = vmax.xlane.f32.xlu2 %v514_v0  ;;  %v579_v29 = vsel %vm575_vm15, %v514_v0, 0.0 }
 0x1a6   : > { %v515_v1 = vpop.f32.mrf.mxu2 }
 0x1a7   : > { %v516_v2 = vadd.f32 %v810_v62, %v515_v1  ;;  %v768_v1 = vsel %vm594_vm7, 1.0, %v837_v27 }
 0x1a9   : > { %525 = vmax.xlane.f32.xlu1 %v516_v2 }
 0x1ae   : > { %v518_v7 = vpop.f32.mrf.mxu3 }
 0x1af   : > { %v519_v8 = vadd.f32 %v810_v62, %v518_v7 }
 0x1b1   : > { %527 = vmax.xlane.f32.xlu0 %v519_v8 }
 0x1b6   : > { %v520_v9 = vpop.f32.mrf.mxu3 }
 0x1b7   : > { %v521_v10 = vadd.f32 %v810_v62, %v520_v9 }
 0x1b9   : > { %529 = vmax.xlane.f32.xlu2 %v521_v10 }
 0x1c2   : > { %567 = vperm.xlu1 %808, %v898_v5  }
 0x1c5   : > { %570 = vperm.xlu0 %809, %v895_v4  }
 0x1d1   : > { %573 = vperm.xlu2 %807, %v902_v6  }
 0x214   : > { %v524_v12 = vpop.xlane.xlu2 %523 }
 0x215   : > { %v531_v13 = vsub.f32 %v514_v0, %v524_v12 }
 0x217   : > { %v535_v14 = vmul.f32 1.442695, %v531_v13 }
 0x219   : > { %811 = vpow2.f32 %v535_v14 }
 0x21c   : > { %v526_v15 = vpop.xlane.xlu1 %525 }
 0x21d   : > { %v532_v16 = vsub.f32 %v516_v2, %v526_v15 }
 0x21f   : > { %v812_v17 = vpop.eup %811  ;;  %v537_v18 = vmul.f32 1.442695, %v532_v16 }
 0x220   : > { %543 = vadd.xlane.f32.xlu1 %v812_v17 }
 0x221   : > { %813 = vpow2.f32 %v537_v18 }
 0x224   : > { %v528_v19 = vpop.xlane.xlu0 %527 }
 0x225   : > { %v533_v20 = vsub.f32 %v519_v8, %v528_v19 }
 0x227   : > { %v814_v21 = vpop.eup %813  ;;  %v539_v22 = vmul.f32 1.442695, %v533_v20 }
 0x228   : > { %545 = vadd.xlane.f32.xlu2 %v814_v21 }
 0x229   : > { %815 = vpow2.f32 %v539_v22 }
 0x22c   : > { %v530_v24 = vpop.xlane.xlu2 %529 }
 0x22d   : > { %v534_v25 = vsub.f32 %v521_v10, %v530_v24 }
 0x22f   : > { %v816_v26 = vpop.eup %815  ;;  %v541_v28 = vmul.f32 1.442695, %v534_v25 }
 0x230   : > { %547 = vadd.xlane.f32.xlu0 %v816_v26  ;;  %583 = vadd.xlane.f32.xlu2 %v579_v29 }
 0x231   : > { %817 = vpow2.f32 %v541_v28 }
 0x234   : > { %v568_v32 = vpop.permute.xlu1 %567  ;;  %v574_v35 = vpop.permute.xlu2 %573 }
 0x235   : > { %vm576_vm1 = vcmp.eq.s32.totalorder %v927_v23, %v568_v32  ;;  %vm578_vm2 = vcmp.eq.s32.totalorder %v927_v23, %v574_v35 }
 0x236   : > { %v580_v34 = vsel %vm576_vm1, %v516_v2, 0.0  ;;  %v582_v36 = vsel %vm578_vm2, %v521_v10, 0.0 }
 0x237   : > { %v818_v30 = vpop.eup %817  ;;  %v571_v31 = vpop.permute.xlu0 %570 }
 0x238   : > { %vm577_vm0 = vcmp.eq.s32.totalorder %v927_v23, %v571_v31  ;;  %549 = vadd.xlane.f32.xlu1 %v818_v30 }
 0x239   : > { %v581_v33 = vsel %vm577_vm0, %v519_v8, 0.0 }
 0x23a   : > { %587 = vadd.xlane.f32.xlu2 %v581_v33 }
 0x240   : > { %585 = vadd.xlane.f32.xlu1 %v580_v34 }
 0x248   : > { %589 = vadd.xlane.f32.xlu1 %v582_v36 }
 0x293   : > { %v544_v37 = vpop.xlane.xlu1 %543 }
 0x294   : > { %819 = vlog2.f32 %v544_v37 }
 0x29a   : > { %v820_v40 = vpop.eup %819 }
 0x29b   : > { %v546_v38 = vpop.xlane.xlu2 %545  ;;  %v552_v45 = vmul.f32 0.6931472, %v820_v40 }
 0x29c   : > { %821 = vlog2.f32 %v546_v38 }
 0x29d   : > { %v559_v48 = vadd.f32 %v552_v45, %v524_v12 }
 0x2a2   : > { %v822_v41 = vpop.eup %821 }
 0x2a3   : > { %v548_v39 = vpop.xlane.xlu0 %547  ;;  %v584_v43 = vpop.xlane.xlu2 %583  ;;  %v554_v46 = vmul.f32 0.6931472, %v822_v41 }
 0x2a4   : > { %823 = vlog2.f32 %v548_v39  ;;  %v603_v23 = vsub.f32 %v559_v48, %v584_v43 }
 0x2a5   : > { %v560_v50 = vadd.f32 %v554_v46, %v526_v15 }
 0x2a6   : > { %v607_v57 = vmul.f32 %v765_v52, %v603_v23 }
 0x2a8   : > { %v612_v61 = vsel %vm611_vm6, %v607_v57, 0.0 }
 0x2aa   : > { %v824_v42 = vpop.eup %823 }
 0x2ab   : > { %v550_v44 = vpop.xlane.xlu1 %549  ;;  %v556_v47 = vmul.f32 0.6931472, %v824_v42 }
 0x2ac   : > { %825 = vlog2.f32 %v550_v44 }
 0x2ad   : > { %v561_v49 = vadd.f32 %v556_v47, %v528_v19  ;;  %v588_v53 = vpop.xlane.xlu2 %587 }
 0x2af   : > { %v605_v59 = vsub.f32 %v561_v49, %v588_v53 }
 0x2b1   : > { %v609_v62 = vmul.f32 %v767_v3, %v605_v59 }
 0x2b2   : > { %v826_v51 = vpop.eup %825 }
 0x2b3   : > { %v586_v55 = vpop.xlane.xlu1 %585  ;;  %v558_v58 = vmul.f32 0.6931472, %v826_v51  ;;  %v615_v7 = vsel %vm611_vm6, %v609_v62, 0.0 }
 0x2b4   : > { %v604_v56 = vsub.f32 %v560_v50, %v586_v55 }
 0x2b5   : > { %v562_v63 = vadd.f32 %v558_v58, %v530_v24 }
 0x2b6   : > { %v608_v60 = vmul.f32 %v766_v54, %v604_v56 }
 0x2b8   : > { %v613_v5 = vsel %vm611_vm6, %v608_v60, 0.0 }
 0x2b9   : > { %v614_v0 = vadd.f32 %v613_v5, %v612_v61 }
 0x2bb   : > { %v590_v2 = vpop.xlane.xlu1 %589  ;;  %v616_v9 = vadd.f32 %v615_v7, %v614_v0 }
 0x2bc   : > { %v606_v4 = vsub.f32 %v562_v63, %v590_v2 }
 0x2be   : > { %v610_v8 = vmul.f32 %v768_v1, %v606_v4 }
 0x2c0   : > { %v617_v10 = vsel %vm611_vm6, %v610_v8, 0.0 }
 0x2c1   : > { %v618_v11 = vadd.f32 %v617_v10, %v616_v9 }
 0x2c3   : > { %v619_v12 = vrot.slane %v618_v11, 4 }
 0x2c5   : > { %v620_v13 = vadd.f32 %v619_v12, %v618_v11 }
 0x2c7   : > { %v621_v14 = vrot.slane %v620_v13, 2 }
 0x2c9   : > { %v622_v15 = vadd.f32 %v621_v14, %v620_v13 }
 0x2cb   : > { %v623_v16 = vrot.slane %v622_v15, 1 }
 0x2cd   : > { %v624_v6 = vadd.f32 %v623_v16, %v622_v15 }
 0x2cf   : > { %627 = vperm.xlu2 %807, %v624_v6  }
 0x329   : > { %v628_v17 = vpop.permute.xlu2 %627 }
 0x32a   : > { %630 = vst [vmem:[%s291_s13] sm:$0x1] %v628_v17 }
 0x32b PF: > { %s16_s21 = sadd.s32 1, %s833_s21  }
 0x32c   : > { %p13_p5 = scmp.ge.s32.totalorder %s16_s21, 4  }
 0x32e   :  { %15 = sbr.rel (!%p13_p5) target bundleno = 1 (0x1), region = 80 }

</bundles_post_ra>
